<compile_context>
chip_gen: v6e
topology: v6e:2x2x1
jax: 0.10.0
libtpu: 0.0.40
codegen_flags: <defaults>
</compile_context>

<pallas_src>
import math

import jax
import jax.numpy as jnp
from jax.experimental import pallas as pl
from jax.experimental.pallas import tpu as pltpu

_LANES = 128
_TARGET_TILE_BYTES = 2 << 20   # ~2 MiB per q tile (near the HBM-roofline plateau)
_VMEM_LIMIT_BYTES = 32 << 20   # explicit; safe on v5e/v6e (128 MiB) and v7x (64 MiB)


# ----------------------------------------------------------------------------- tables
def make_rope_tables(max_position: int, embedding_size: int):
    """Reproduces RoPEPositionEncoding.__init__ buffers (cos_position, sin_position)."""
    pos = jnp.arange(max_position, dtype=jnp.float32)[:, None]              # [P, 1]
    div = jnp.exp(jnp.arange(0, embedding_size, 2, dtype=jnp.float32)
                  * (-math.log(10000.0) / embedding_size))                  # [D/2]
    ang = pos * div[None, :]                                                 # [P, D/2]
    cos_position = jnp.repeat(jnp.cos(ang), 2, axis=-1)                      # [P, D]
    sin_position = jnp.repeat(jnp.sin(ang), 2, axis=-1)                      # [P, D]
    return cos_position, sin_position


def prepare_rope_tables(cos_position, sin_position, dtype=jnp.float32):
    """One-time table prep (hoisted out of forward): fold the pair sign into sin
    (-sin on even features, +sin on odd) and cast to the compute dtype."""
    D = cos_position.shape[-1]
    sign = jnp.where(jnp.arange(D) % 2 == 0, -1.0, 1.0).astype(jnp.float32)
    cos = cos_position.astype(dtype)
    sin_signed = (sin_position * sign[None, :]).astype(dtype)
    return cos, sin_signed


# ----------------------------------------------------------------------------- kernel
def _rope_kernel(q_ref, cos_ref, sin_ref, o_ref):
    # 2-D lane-dense tiles: q/o/cos/sin are (rows, 128). sin already carries the sign.
    q = q_ref[...]
    cos = cos_ref[...]
    sin = sin_ref[...]

    c = q.shape[-1]
    # Pair swap: output lane 2i needs q[2i+1], lane 2i+1 needs q[2i].
    # Two non-negative lane rolls (XLU slot, ~free) + an even/odd lane select driven
    # by a tiny (1, C) mask. Cyclic wraparound only lands on lanes the select discards.
    q_next = pltpu.roll(q, shift=c - 1, axis=1)   # q[..., j+1] (cyclic)
    q_prev = pltpu.roll(q, shift=1, axis=1)       # q[..., j-1] (cyclic)
    lane = jax.lax.broadcasted_iota(jnp.int32, (1, c), 1)
    even = (lane % 2) == 0
    swapped = jnp.where(even, q_next, q_prev)

    o_ref[...] = (q * cos + swapped * sin).astype(o_ref.dtype)


# --------------------------------------------------------------------------- tiling
def _round_up(x: int, m: int) -> int:
    return ((x + m - 1) // m) * m


def _sublanes(itemsize: int) -> int:
    # sublane packing per vreg: 8 for 4-byte, 16 for 2-byte, 32 for 1-byte dtypes
    return max(8, 32 // max(1, itemsize))


def _choose_row_tile(num_rows: int, row_bytes: int, sub: int, target_bytes: int) -> int:
    """Largest row tile ~target_bytes; multiple of the sublane packing (or the full
    dim); prefer a tile that divides num_rows so the last block isn't ragged."""
    t = max(1, target_bytes // max(1, row_bytes))
    if t >= num_rows:
        return num_rows
    t = max(sub, (t // sub) * sub)
    t = min(t, num_rows)
    cand = t
    while cand >= sub:
        if num_rows % cand == 0:
            return cand
        cand -= sub
    return t


# --------------------------------------------------------------------------- forward
def rope_forward(qw: jax.Array, cos_prepared: jax.Array, sin_prepared: jax.Array,
                 *, donate_qw: bool = False,
                 target_tile_bytes: int = _TARGET_TILE_BYTES):
    """qw: [..., S, D]; cos_prepared/sin_prepared from prepare_rope_tables."""
    orig_shape = qw.shape
    assert qw.ndim >= 2, "qw must be at least [seq, hidden]"
    S, D = orig_shape[-2], orig_shape[-1]
    assert D % 2 == 0, "RoPE requires an even hidden size"
    assert S <= cos_prepared.shape[0], "seq_len exceeds max_position of the tables"

    B = 1
    for d in orig_shape[:-2]:
        B *= int(d)
    B = max(B, 1)

    dtype = qw.dtype
    itemsize = jnp.dtype(dtype).itemsize
    sub = _sublanes(itemsize)

    cos = cos_prepared[:S].astype(dtype)          # no-op if tables prepared in `dtype`
    sin = sin_prepared[:S].astype(dtype)

    # Lane-dense layout: fold (S, D) into rows of 128 lanes. Pad the flattened
    # per-batch tail (< 128 elems) when needed so every store is a full unmasked vst.
    flat = S * D
    flat_pad = _round_up(flat, _LANES)
    pad = flat_pad - flat
    C = _LANES
    R = flat_pad // C

    qf = qw.reshape(B, flat)
    cosf = cos.reshape(flat)
    sinf = sin.reshape(flat)
    if pad:
        qf = jnp.pad(qf, ((0, 0), (0, pad)))
        cosf = jnp.pad(cosf, (0, pad))
        sinf = jnp.pad(sinf, (0, pad))
    cos2d = cosf.reshape(R, C)
    sin2d = sinf.reshape(R, C)

    row_bytes = C * itemsize
    per_batch_bytes = R * row_bytes
    io_alias = {0: 0} if donate_qw else {}

    # ---- Path B: small per-batch work -> pack k batches' rows into one grid step.
    use_batched_rows = (B > 1) and (per_batch_bytes < target_tile_bytes)
    k = 1
    if use_batched_rows:
        k = max(1, min(B, target_tile_bytes // per_batch_bytes))
        if pl.cdiv(B, k) < 2:            # keep >= 2 steps (both v7x TensorCores busy)
            k = max(1, B // 2)
        # Block-shape legality: second-to-last dim must be a multiple of the sublane
        # packing (or the full dim); shrink k until k*R qualifies, else fall back.
        while k > 1 and (k * R) % sub != 0:
            k -= 1
        if (k * R) % sub != 0 and (k * R) != B * R:
            use_batched_rows = False

    if use_batched_rows:
        t_rows = k * R
        q_rows = qf.reshape(B * R, C)
        cos_rep = jnp.tile(cos2d, (k, 1)) if k > 1 else cos2d      # resident block
        sin_rep = jnp.tile(sin2d, (k, 1)) if k > 1 else sin2d
        grid = (pl.cdiv(B * R, t_rows),)

        out_rows = pl.pallas_call(
            _rope_kernel,
            out_shape=jax.ShapeDtypeStruct((B * R, C), dtype),
            grid_spec=pltpu.PrefetchScalarGridSpec(
                num_scalar_prefetch=0,
                grid=grid,
                in_specs=[
                    pl.BlockSpec((t_rows, C), lambda i: (i, 0)),
                    pl.BlockSpec((t_rows, C), lambda i: (0, 0)),   # stays resident
                    pl.BlockSpec((t_rows, C), lambda i: (0, 0)),   # stays resident
                ],
                out_specs=pl.BlockSpec((t_rows, C), lambda i: (i, 0)),
            ),
            compiler_params=pltpu.CompilerParams(
                dimension_semantics=("parallel",),
                vmem_limit_bytes=_VMEM_LIMIT_BYTES),
            input_output_aliases=io_alias,
        )(q_rows, cos_rep, sin_rep)
        out2d = out_rows.reshape(B, R, C)
    else:
        # ---- Path A: per-batch tiles, batch innermost so cos/sin blocks stay resident.
        q3d = qf.reshape(B, R, C)
        tR = _choose_row_tile(R, row_bytes, sub, target_tile_bytes)
        grid_r = pl.cdiv(R, tR)
        if grid_r * B == 1 and R >= 2 * sub:      # avoid a degenerate 1-step grid
            tR = _round_up(pl.cdiv(R, 2), sub)
            grid_r = pl.cdiv(R, tR)

        out2d = pl.pallas_call(
            _rope_kernel,
            out_shape=jax.ShapeDtypeStruct((B, R, C), dtype),
            grid_spec=pltpu.PrefetchScalarGridSpec(
                num_scalar_prefetch=0,
                grid=(grid_r, B),                 # batch innermost
                in_specs=[
                    pl.BlockSpec((pl.Squeezed(), tR, C), lambda r, b: (b, r, 0)),
                    pl.BlockSpec((tR, C), lambda r, b: (r, 0)),
                    pl.BlockSpec((tR, C), lambda r, b: (r, 0)),
                ],
                out_specs=pl.BlockSpec((pl.Squeezed(), tR, C), lambda r, b: (b, r, 0)),
            ),
            compiler_params=pltpu.CompilerParams(
                dimension_semantics=("parallel", "parallel"),
                vmem_limit_bytes=_VMEM_LIMIT_BYTES),
            input_output_aliases=io_alias,
        )(q3d, cos2d, sin2d)

    out_flat = out2d.reshape(B, flat_pad)
    if pad:
        out_flat = out_flat[:, :flat]
    return out_flat.reshape(orig_shape)


# ---------------------------------------------------------------------- module mirror
class RoPEPositionEncoding:
    """Minimal JAX mirror of the PyTorch module (tables prepared once)."""

    def __init__(self, max_position: int, embedding_size: int, dtype=jnp.float32):
        self.cos_position, self.sin_position = make_rope_tables(max_position,
                                                                embedding_size)
        self._cos, self._sin_signed = prepare_rope_tables(
            self.cos_position, self.sin_position, dtype)

    def __call__(self, qw, donate_qw: bool = False):
        return rope_forward(qw, self._cos, self._sin_signed, donate_qw=donate_qw)


def rope_forward_ref(qw, cos_position, sin_position):
    """Pure-JAX reference matching the PyTorch forward exactly."""
    S = qw.shape[-2]
    qw2 = jnp.stack([-qw[..., 1::2], qw[..., ::2]], axis=-1).reshape(qw.shape)
    return qw * cos_position[:S] + qw2 * sin_position[:S]


if __name__ == "__main__":
    B, S, D = 2, 8, 32
    max_position = 16

    key = jax.random.PRNGKey(0)
    qw = jax.random.normal(key, (B, S, D), dtype=jnp.float32)

    rope = RoPEPositionEncoding(max_position, D)
    out = jax.block_until_ready(rope(qw))

    ref = rope_forward_ref(qw, rope.cos_position, rope.sin_position)
    assert out.shape == qw.shape
    assert jnp.allclose(out, ref, atol=1e-5, rtol=1e-5), "mismatch vs reference"

    print("KERNEL_OK")
</pallas_src>

<mosaic_0001>
module attributes {stable_mosaic.version = 11 : i64} {
  func.func @_rope_kernel(%arg0: i32, %arg1: i32, %arg2: memref<1x2x128xf32, #tpu.memory_space<vmem>>, %arg3: memref<2x128xf32, #tpu.memory_space<vmem>>, %arg4: memref<2x128xf32, #tpu.memory_space<vmem>>, %arg5: memref<1x2x128xf32, #tpu.memory_space<vmem>>) attributes {dimension_semantics = [#tpu.dimension_semantics<parallel>, #tpu.dimension_semantics<parallel>], iteration_bounds = array<i64: 1, 2>, scalar_prefetch = 0 : i64, scratch_operands = 0 : i64, tpu.core_type = #tpu.core_type<tc>, window_params = [{transform_indices = @transform_0, window_bounds = array<i64: 1, 2, 128>}, {transform_indices = @transform_1, window_bounds = array<i64: 2, 128>}, {transform_indices = @transform_2, window_bounds = array<i64: 2, 128>}, {transform_indices = @transform_3, window_bounds = array<i64: 1, 2, 128>}]} {
    %c0 = arith.constant 0 : index
    %c0_0 = arith.constant 0 : index
    %c0_1 = arith.constant 0 : index
    %0 = vector.load %arg2[%c0, %c0_0, %c0_1] : memref<1x2x128xf32, #tpu.memory_space<vmem>>, vector<1x2x128xf32>
    %1 = vector.shape_cast %0 : vector<1x2x128xf32> to vector<2x128xf32>
    %c0_2 = arith.constant 0 : index
    %c0_3 = arith.constant 0 : index
    %2 = vector.load %arg3[%c0_2, %c0_3] : memref<2x128xf32, #tpu.memory_space<vmem>>, vector<2x128xf32>
    %c0_4 = arith.constant 0 : index
    %c0_5 = arith.constant 0 : index
    %3 = vector.load %arg4[%c0_4, %c0_5] : memref<2x128xf32, #tpu.memory_space<vmem>>, vector<2x128xf32>
    %c127_i32 = arith.constant 127 : i32
    %4 = tpu.dynamic_rotate %1 by %c127_i32 dim 1 : vector<2x128xf32>, i32 -> vector<2x128xf32>
    %c1_i32 = arith.constant 1 : i32
    %5 = tpu.dynamic_rotate %1 by %c1_i32 dim 1 : vector<2x128xf32>, i32 -> vector<2x128xf32>
    %6 = tpu.iota {dimensions = array<i32: 1>} : vector<1x128xi32>
    %c2_i32 = arith.constant 2 : i32
    %c0_i32 = arith.constant 0 : i32
    %7 = arith.cmpi eq, %c2_i32, %c0_i32 : i32
    %c1_i32_6 = arith.constant 1 : i32
    %8 = arith.select %7, %c1_i32_6, %c2_i32 : i32
    %9 = vector.broadcast %8 : i32 to vector<1x128xi32>
    %10 = arith.remsi %6, %9 : vector<1x128xi32>
    %c0_i32_7 = arith.constant 0 : i32
    %11 = vector.broadcast %c0_i32_7 : i32 to vector<1x128xi32>
    %12 = arith.cmpi ne, %10, %11 : vector<1x128xi32>
    %c0_i32_8 = arith.constant 0 : i32
    %13 = vector.broadcast %c0_i32_8 : i32 to vector<1x128xi32>
    %14 = arith.cmpi slt, %10, %13 : vector<1x128xi32>
    %c0_i32_9 = arith.constant 0 : i32
    %15 = arith.cmpi slt, %8, %c0_i32_9 : i32
    %16 = vector.broadcast %15 : i1 to vector<1x128xi1>
    %17 = vector.broadcast %16 : vector<1x128xi1> to vector<1x128xi1>
    %18 = arith.xori %14, %17 : vector<1x128xi1>
    %19 = arith.andi %18, %12 : vector<1x128xi1>
    %20 = vector.broadcast %8 : i32 to vector<1x128xi32>
    %21 = arith.addi %10, %20 : vector<1x128xi32>
    %22 = arith.select %19, %21, %10 : vector<1x128xi1>, vector<1x128xi32>
    %c0_i32_10 = arith.constant 0 : i32
    %23 = vector.broadcast %c0_i32_10 : i32 to vector<1x128xi32>
    %24 = arith.cmpi eq, %22, %23 : vector<1x128xi32>
    %25 = vector.shape_cast %24 : vector<1x128xi1> to vector<1x128xi1>
    %26 = vector.broadcast %25 : vector<1x128xi1> to vector<2x128xi1>
    %27 = arith.select %26, %4, %5 : vector<2x128xi1>, vector<2x128xf32>
    %28 = arith.mulf %1, %2 : vector<2x128xf32>
    %29 = arith.mulf %27, %3 : vector<2x128xf32>
    %30 = arith.addf %28, %29 : vector<2x128xf32>
    %c0_11 = arith.constant 0 : index
    %c0_12 = arith.constant 0 : index
    %c0_13 = arith.constant 0 : index
    %31 = vector.load %arg5[%c0_11, %c0_12, %c0_13] : memref<1x2x128xf32, #tpu.memory_space<vmem>>, vector<1x2x128xf32>
    %32 = vector.shape_cast %31 : vector<1x2x128xf32> to vector<2x128xf32>
    %33 = vector.shape_cast %30 : vector<2x128xf32> to vector<1x2x128xf32>
    tpu.vector_store %arg5[%c0_11, %c0_12, %c0_13], %33 {strides = array<i32>} : memref<1x2x128xf32, #tpu.memory_space<vmem>>, vector<1x2x128xf32>,
    return
  }
  func.func @transform_0(%arg0: i32, %arg1: i32) -> (i32, i32, i32) {
    %c0_i32 = arith.constant 0 : i32
    %c0_i32_0 = arith.constant 0 : i32
    return %arg1, %arg0, %c0_i32 : i32, i32, i32
  }
  func.func @transform_1(%arg0: i32, %arg1: i32) -> (i32, i32) {
    %c0_i32 = arith.constant 0 : i32
    %c0_i32_0 = arith.constant 0 : i32
    return %arg0, %c0_i32 : i32, i32
  }
  func.func @transform_2(%arg0: i32, %arg1: i32) -> (i32, i32) {
    %c0_i32 = arith.constant 0 : i32
    %c0_i32_0 = arith.constant 0 : i32
    return %arg0, %c0_i32 : i32, i32
  }
  func.func @transform_3(%arg0: i32, %arg1: i32) -> (i32, i32, i32) {
    %c0_i32 = arith.constant 0 : i32
    %c0_i32_0 = arith.constant 0 : i32
    return %arg1, %arg0, %c0_i32 : i32, i32, i32
  }
}

</mosaic_0001>

<bundles_post_ra>
// kernel: tpu_custom_call.1
= control target key start
LH: loop header
LB: loop body
LE: loop exit
PB: predicated region body
PF: predicated region fallthrough
CT: control target
= control target key end

     0   :  { %8 = vsyncpa [#allocation3], 0  ;;  %s811_s0 = inlined_call_operand.hbm [shape: f32[2,2,128], index: 0, kind: input, shape index: {}]   ;;  %s812_s1 = inlined_call_operand.hbm [shape: f32[2,128], index: 1, kind: input, shape index: {}]   ;;  %s813_s2 = inlined_call_operand.vmem [shape: f32[2,128], index: 2, kind: input, shape index: {}]   ;;  %s814_s3 = inlined_call_operand.hbm [shape: f32[2,2,128], index: 3, kind: output, shape index: {}]  }
   0x1   :  { %10 = vsyncpa [#allocation3 + $0x1], 0 }
   0x2   :  { %11 = vsyncpa [#allocation6], 0 }
   0x3   :  { %12 = vsyncpa [#allocation4], 0 }
   0x4   :  { %14 = vsyncpa [#allocation4 + $0x1], 0  ;;  %s647_s12 = smov 0   ;;  %s649_s13 = smov 0  }
   0x5   :  { %s651_s14 = smov 0   ;;  %s653_s15 = smov 0  }
   0x6   :  { %s655_s16 = smov 0   ;;  %s657_s17 = smov 0  }
   0x7 LB: > { %s391_s18 = sadd.s32 4294967295, %s620_s17   ;;  %s392_s19 = sadd.s32 4294967294, %s620_s17   ;;  %s620_s17 = sphi %s657_s17, %s20_s17   ;;  %s616_s16 = sphi %s655_s16, %s831_s16   ;;  %s612_s15 = sphi %s653_s15, %s830_s15   ;;  %s608_s14 = sphi %s651_s14, %s829_s14   ;;  %s604_s13 = sphi %s649_s13, %s828_s13   ;;  %s600_s12 = sphi %s647_s12, %s827_s12  }
   0x8   : > { %p54_p0 = scmp.ne.s32.totalorder %s604_s13, %s600_s12  ;;  %p681_p1 = scmp.eq.s32.totalorder %s391_s18, 0 }
   0x9   : > { %p685_p2 = scmp.eq.s32.totalorder %s391_s18, 1  ;;  %p138_p3 = scmp.eq.s32.totalorder %s392_s19, 1 }
   0xa   : > { %p691_p4 = por %p681_p1, %p54_p0  ;;  %p393_p5 = scmp.ge.s32.totalorder %s620_s17, 1 }
   0xb   : > { %p696_p6 = por %p138_p3, %p54_p0  ;;  %p145_p7 = scmp.lt.s32.totalorder %s620_s17, 3 }
   0xc   : > { %s818_s22 = scalar_select %p691_p4, 1, 0 }
   0xd   : > { %s819_s23 = scalar_select %p696_p6, 1, 0 }
   0xe   : > { %p701_p8 = pnand %p393_p5, %p145_p7  ;;  %s622_s25 = smov [#allocation5]  }
   0xf   : > { %s160_s26 = sshll.u32 %s622_s25, 4  ;;  %s29_s28 = sadd.s32 1, %s616_s16  ;;  %s161_s26 = int_to_ptr.vmem [resolvable:$true] %s160_s26 }
  0x10   : > { %p415_p10 = pneg %p701_p8  ;;  %s41_s29 = sadd.s32 1, %s608_s14 }
  0x11   : > { %p30_p12 = scmp.ge.s32.totalorder %s29_s28, 2  ;;  %s493_s30 = scalar_lea.vmem %s161_s26, 32 }
  0x12   : > { %p710_p11 = pnand %p415_p10, %p681_p1  ;;  %p494_p0 = scmp.ne.s32.totalorder %s161_s26, %s493_s30 }
  0x13   : > { %p501_p7 = scmp.lt.s32.totalorder %s161_s26, %s161_s26  ;;  %p502_p6 = scmp.lt.s32.totalorder %s493_s30, %s493_s30 }
  0x14   : > { %p484_p13 = pneg %p710_p11 }
  0x15   : > { %p503_p9 = por %p502_p6, %p501_p7 }
  0x16   : > { %p496_p3 = pnand %p494_p0, %p484_p13 }
  0x18   : > { %p497_p5 = pneg %p496_p3 }
  0x1a   : > { %p504_p4 = pnand %p503_p9, %p497_p5 }
  0x1c   : > { %507 = shalt.err (!%p504_p4)
}
  0x1d   : > { %418 = dma.hbm_to_vmem [thread:$0]  (!%p710_p11), %s812_s1, 32, %s161_s26, [#allocation6]  }
  0x1e   : > { %s833_s28 = smov (%p30_p12, %s29_s28), 0  ;;  %p48_p6 = scmp.ne.s32.totalorder %s608_s14, %s604_s13 }
  0x1f   : > { %p49_p4 = scmp.eq.s32.totalorder %s620_s17, 0  ;;  %s36_s6 = ssub.s32 %s616_s16, %s833_s28 }
  0x20   : > { %p428_p9 = scmp.lt.s32.totalorder %s620_s17, 2  ;;  %p39_p10 = scmp.eq.s32.totalorder %s36_s6, 0 }
  0x21   : > { %p50_p13 = por %p49_p4, %p48_p6  ;;  %p733_p0 = por %p685_p2, %p48_p6 }
  0x22   : > { %s178_s8 = sand.u32 1, %s608_s14   ;;  %s398_s11 = sshll.u32 %s616_s16, 5 }
  0x23   : > { %s739_s9 = scalar_select %p39_p10, %s608_s14, %s41_s29  }
  0x24   : > { %s397_s10 = sshll.u32 %s178_s8, 1  ;;  %s188_s25 = scalar_lea.hbm %s811_s0, %s398_s11 }
  0x25   : > { %s182_s26 = scalar_lea.vmem [#allocation2], %s397_s10  ;;  %p745_p11 = pnand %p428_p9, %p50_p13 }
  0x26   : > { %s190_s27 = sshll.u32 %s182_s26, 4  ;;  %s179_s21 = scalar_lea.sflag [#allocation3], %s178_s8  ;;  %s191_s27 = int_to_ptr.vmem [resolvable:$true] %s190_s27 }
  0x27   : > { %p510_p2 = pneg %p745_p11  ;;  %s521_s4 = scalar_lea.vmem %s191_s27, 32 }
  0x28   : > { %p522_p12 = scmp.ne.s32.totalorder %s191_s27, %s521_s4  ;;  %s623_s29 = smov [#allocation2]  }
  0x29   : > { %s526_s5 = sshll.u32 %s623_s29, 4  ;;  %s527_s5 = int_to_ptr.vmem [resolvable:$false] %s526_s5 }
  0x2a   : > { %p524_p3 = pnand %p522_p12, %p510_p2  ;;  %s528_s6 = scalar_lea.vmem %s527_s5, 64 }
  0x2b   : > { %p529_p7 = scmp.lt.s32.totalorder %s191_s27, %s527_s5  ;;  %p530_p6 = scmp.lt.s32.totalorder %s528_s6, %s521_s4 }
  0x2c   : > { %p525_p5 = pneg %p524_p3 }
  0x2d   : > { %p531_p4 = por %p530_p6, %p529_p7 }
  0x2f   : > { %p532_p10 = pnand %p531_p4, %p525_p5 }
  0x31   : > { %535 = shalt.err (!%p532_p10)
}
  0x32   : > { %422 = dma.hbm_to_vmem [thread:$0]  (!%p745_p11), %s188_s25, 32, %s191_s27, %s179_s21  }
  0x33   : > { %199 = sbr.rel (%p701_p8) target bundleno = 197 (0xc5), region = 32  ;;  %s756_s8 = sand.u32 (!%p701_p8), 1, %s604_s13  }
  0x34   : > { %s400_s10 = sshll.u32 (!%p701_p8), %s756_s8, 1  ;;  %s202_s11 = scalar_lea.sflag (!%p701_p8), [#allocation3], %s756_s8 }
  0x35   : > { %s205_s18 = scalar_lea.vmem (!%p701_p8), [#allocation2], %s400_s10  ;;  %p824_p9 = scmp.ne.s32.totalorder (!%p701_p8), %s818_s22, 0 }
  0x38   : > { %587 = dma.done.wait (%p824_p9), %s202_s11, 32  }
  0x39   : > { %589 = vsyncadd (%p824_p9), %s202_s11, 4294967264 }
  0x3a   : > { %591 = dma.done.wait (%p681_p1), [#allocation6], 32  }
  0x3b   : > { %593 = vsyncadd (%p681_p1), [#allocation6], 4294967264  ;;  %v240_v0 = vld [vmem:[%s205_s18] sm:$0x3]  ;;  %s624_s24 = smov 127   ;;  %s625_s19 = smov 1   ;;  %v247_v1 = vlaneseq }
  0x3c   : > { %243 = vrot.lane.b32.xlu0 %v240_v0, %s624_s24  ;;  %v241_v5 = vld [vmem:[#allocation5] sm:$0x3]  ;;  %v242_v6 = vld [vmem:[%s813_s2] sm:$0x3]  ;;  %s404_s20 = sshll.u32 %s612_s15, 5  ;;  %s235_s26 = scalar_lea.vmem [#allocation7], %s400_s10 }
  0x3d   : > { %v248_v2 = vand.u32 127, %v247_v1  ;;  %v265_v7 = vmul.f32 %v241_v5, %v240_v0  ;;  %s284_s27 = sshll.u32 %s235_s26, 4  ;;  %s282_s4 = scalar_lea.hbm %s814_s3, %s404_s20  ;;  %s285_s27 = int_to_ptr.vmem [resolvable:$true] %s284_s27 }
  0x3e   : > { %s270_s29 = scalar_lea.sflag [#allocation4], %s756_s8  ;;  %s536_s5 = scalar_lea.vmem %s285_s27, 32 }
  0x3f   : > { %v253_v3 = vand.u32 1, %v248_v2  ;;  %p537_p1 = scmp.ne.s32.totalorder %s285_s27, %s536_s5  ;;  %s626_s6 = smov [#allocation7]  }
  0x40   : > { %245 = vrot.lane.b32.xlu0 %v240_v0, %s625_s19  ;;  %s540_s11 = sshll.u32 %s626_s6, 4  ;;  %s541_s11 = int_to_ptr.vmem [resolvable:$false] %s540_s11 }
  0x41   : > { %vm261_vm0 = vcmp.eq.s32.totalorder %v253_v3, 0  ;;  %p538_p8 = pnand %p537_p1, %p733_p0  ;;  %s542_s15 = scalar_lea.vmem %s541_s11, 64 }
  0x42   : > { %p543_p11 = scmp.lt.s32.totalorder %s285_s27, %s541_s11  ;;  %p544_p2 = scmp.lt.s32.totalorder %s542_s15, %s536_s5 }
  0x43   : > { %p539_p13 = pneg %p538_p8 }
  0x44   : > { %p545_p12 = por %p544_p2, %p543_p11 }
  0x46   : > { %p546_p3 = pnand %p545_p12, %p539_p13 }
  0xae   : > { %v244_v4 = vpop.permute.xlu0 %243 }
  0xb2   : > { %v246_v8 = vpop.permute.xlu0 %245 }
  0xb3   : > { %v264_v9 = vsel %vm261_vm0, %v244_v4, %v246_v8 }
  0xb4   : > { %v266_v10 = vmul.f32 %v264_v9, %v242_v6 }
  0xb6   : > { %v267_v11 = vadd.f32 %v266_v10, %v265_v7 }
  0xb8   : > { %268 = vst [vmem:[%s235_s26] sm:$0x3] %v267_v11 }
  0xb9   : > { %549 = shalt.err (!%p546_p3)
}
  0xba   : > { %s550_s10 = scalar_lea.hbm %s282_s4, 32  ;;  %s554_s24 = scalar_lea.hbm %s814_s3, 64 }
  0xbb   : > { %p551_p5 = scmp.ne.s32.totalorder %s282_s4, %s550_s10  ;;  %p555_p4 = scmp.lt.s32.totalorder %s282_s4, %s814_s3 }
  0xbc   : > { %p556_p10 = scmp.lt.s32.totalorder %s554_s24, %s550_s10 }
  0xbd   : > { %p552_p7 = pnand %p551_p5, %p733_p0 }
  0xbe   : > { %p557_p9 = por %p556_p10, %p555_p4 }
  0xbf   : > { %p553_p6 = pneg %p552_p7 }
  0xc1   : > { %p558_p1 = pnand %p557_p9, %p553_p6 }
  0xc3   : > { %561 = shalt.err (!%p558_p1)
}
  0xc4   : > { %413 = dma.vmem_to_hbm [thread:$0]  (%p733_p0), %s285_s27, 32, %s282_s4, %s270_s29  }
  0xc5 PF: > { %s296_s25 = sand.u32 1, %s600_s12   ;;  %p825_p8 = scmp.ne.s32.totalorder %s819_s23, 0 }
  0xc6   : > { %p826_p13 = scmp.ge.s32.totalorder %s620_s17, 2  ;;  %s297_s20 = scalar_lea.sflag [#allocation4], %s296_s25 }
  0xc8   : > { %p424_p11 = pnand %p826_p13, %p825_p8 }
  0xca   : > { %p425_p2 = pneg %p424_p11 }
  0xcc   : > { %595 = dma.done.wait (%p425_p2), %s297_s20, 32  }
  0xcd   : > { %597 = vsyncadd (%p425_p2), %s297_s20, 4294967264  ;;  %s20_s17 = sadd.s32 1, %s620_s17   ;;  %s827_s12 = smov %s604_s13 }
  0xce   : > { %p17_p12 = scmp.ge.s32.totalorder %s20_s17, 4   ;;  %s828_s13 = smov %s608_s14 }
  0xcf   : > { %s829_s14 = smov %s739_s9  ;;  %s830_s15 = smov %s616_s16 }
  0xd0   : > { %s831_s16 = smov %s833_s28  ;;  %19 = sbr.rel (!%p17_p12) target bundleno = 7 (0x7), region = 85 }
  0xd5   :  { %302 = vsyncpa [#allocation3], 1 }
  0xd6   :  { %304 = vsyncpa [#allocation3 + $0x1], 1 }
  0xd7   :  { %305 = vsyncpa [#allocation6], 1 }
  0xd8   :  { %306 = vsyncpa [#allocation4], 1 }
  0xd9   :  { %308 = vsyncpa [#allocation4 + $0x1], 1 }

</bundles_post_ra>
